<compile_context>
chip_gen: v7x
topology: tpu7x:2x2x1
jax: 0.10.0
libtpu: 0.0.40
codegen_flags: <defaults>
</compile_context>

<pallas_src>
import functools

import jax
import jax.numpy as jnp
from jax import lax
from jax.experimental import pallas as pl
from jax.experimental.pallas import tpu as pltpu


NEG_SLOPE = 0.01  # F.leaky_relu default negative_slope
D_IN, H1, H2, D_OUT = 2, 20, 10, 1

# Packed-parameter layout: one (P_ROWS, P_COLS) f32 buffer holding all weights/biases.
#   rows 0:20, cols 0:2   -> w1 (20, 2)     (PyTorch (out, in) layout)
#   rows 0:20, col  2     -> b1 (20,)
#   rows 0:10, cols 3:23  -> w2 (10, 20)
#   rows 0:10, col  23    -> b2 (10,)
#   row  0,    cols 24:34 -> w3 (1, 10)
#   row  0,    col  34    -> b3 (1,)
_B1_COL = D_IN                      # 2
_W2_COL = _B1_COL + 1               # 3
_B2_COL = _W2_COL + H1              # 23
_W3_COL = _B2_COL + 1               # 24
_B3_COL = _W3_COL + H2              # 34
P_ROWS, P_COLS = H1, _B3_COL + 1    # (20, 35)


def _round_up(v, m):
    return ((v + m - 1) // m) * m


def _leaky_relu(x):
    return jnp.where(x > 0, x, NEG_SLOPE * x)


def _discriminator_kernel(xt_ref, p_ref, o_ref, *, chunk, n_chunks):
    # xt_ref: (2, TB) input tile, batch on the lane axis.
    # p_ref : (20, 35) packed weights/biases (pinned block, DMA'd once).
    # o_ref : (1, TB) lane-dense output tile.
    p = p_ref[...]

    # Hoisted once per grid step (NOT per sub-chunk): weight slices and the
    # lane-broadcast biases. JAX does not CSE broadcast_in_dim inside loops.
    w1 = p[0:H1, 0:D_IN]                          # (20, 2)
    w2 = p[0:H2, _W2_COL:_W2_COL + H1]            # (10, 20)
    w3 = p[0:D_OUT, _W3_COL:_W3_COL + H2]         # (1, 10)
    b1 = jnp.broadcast_to(p[0:H1, _B1_COL:_B1_COL + 1], (H1, chunk))
    b2 = jnp.broadcast_to(p[0:H2, _B2_COL:_B2_COL + 1], (H2, chunk))
    b3 = jnp.broadcast_to(p[0:D_OUT, _B3_COL:_B3_COL + 1], (D_OUT, chunk))

    def body(c, carry):
        off = pl.multiple_of(c * chunk, 128)
        xt = xt_ref[:, pl.ds(off, chunk)]         # (2, chunk)

        # All three layers ride the (otherwise idle) MXU slot; VPU only does
        # the bias adds, leaky-relu and sigmoid. Dropout = identity (eval mode).
        h1 = _leaky_relu(b1 + jnp.dot(w1, xt, preferred_element_type=jnp.float32))
        h2 = _leaky_relu(b2 + jnp.dot(w2, h1, preferred_element_type=jnp.float32))
        z = b3 + jnp.dot(w3, h2, preferred_element_type=jnp.float32)

        # Exact sigmoid for parity with torch.sigmoid (divide on (1, chunk) is tiny).
        o_ref[:, pl.ds(off, chunk)] = (1.0 / (1.0 + jnp.exp(-z))).astype(o_ref.dtype)
        return carry

    unroll = n_chunks if n_chunks <= 4 else 4
    lax.fori_loop(0, n_chunks, body, 0, unroll=unroll)


def pack_params(params):
    """Pack all weights/biases (PyTorch (out, in) layout) into one (20, 35) f32 buffer."""
    buf = jnp.zeros((P_ROWS, P_COLS), jnp.float32)
    buf = buf.at[0:H1, 0:D_IN].set(params["w1"].astype(jnp.float32))
    buf = buf.at[0:H1, _B1_COL].set(params["b1"].astype(jnp.float32))
    buf = buf.at[0:H2, _W2_COL:_W2_COL + H1].set(params["w2"].astype(jnp.float32))
    buf = buf.at[0:H2, _B2_COL].set(params["b2"].astype(jnp.float32))
    buf = buf.at[0:D_OUT, _W3_COL:_W3_COL + H2].set(params["w3"].astype(jnp.float32))
    buf = buf.at[0:D_OUT, _B3_COL].set(params["b3"].astype(jnp.float32))
    return buf


@functools.partial(jax.jit, static_argnames=("block_b",))
def discriminator_forward(x, params, *, block_b=2048):
    """x: (B, 2) float32; params: dict of w1,b1,w2,b2,w3,b3 in PyTorch (out, in) layout.

    Returns (B, 1) sigmoid scores, matching Discriminator.forward in eval mode.
    """
    assert block_b % 128 == 0, "batch tile must be lane-aligned (multiple of 128)"
    B = x.shape[0]
    b128 = _round_up(B, 128)
    tb = min(block_b, b128)                        # don't over-pad tiny batches
    # v7x has 2 TensorCores sharing the "parallel" grid axis: keep >= 2 grid tiles
    # whenever the batch spans at least two 128-lane tiles.
    if b128 >= 2 * 128:
        tb = min(tb, _round_up((b128 + 1) // 2, 128))
    # Inner sub-chunk width: largest lane-aligned chunk that divides the tile, so
    # per-grid-step overhead is amortized without blowing vreg pressure.
    chunk = next(c for c in (512, 256, 128) if tb % c == 0)
    n_chunks = tb // chunk
    Bp = _round_up(B, tb)
    num_tiles = Bp // tb

    # Batch-on-lanes layout: (2, Bp), zero-padded to a whole number of tiles.
    # TODO(synk): accept x already transposed to (2, B) upstream to skip this
    #             XLA transpose+pad pass for very large batches.
    xt = jnp.zeros((D_IN, Bp), jnp.float32).at[:, :B].set(x.astype(jnp.float32).T)
    pbuf = pack_params(params)

    out = pl.pallas_call(
        functools.partial(_discriminator_kernel, chunk=chunk, n_chunks=n_chunks),
        out_shape=jax.ShapeDtypeStruct((D_OUT, Bp), jnp.float32),
        grid=(num_tiles,),
        in_specs=[
            pl.BlockSpec((D_IN, tb), lambda i: (0, i)),        # x tile, streamed
            pl.BlockSpec((P_ROWS, P_COLS), lambda i: (0, 0)),  # params, pinned
        ],
        out_specs=pl.BlockSpec((D_OUT, tb), lambda i: (0, i)),  # lane-dense output
        compiler_params=pltpu.CompilerParams(
            dimension_semantics=("parallel",),  # shard batch tiles across TCs (v7x)
        ),
    )(xt, pbuf)

    return out[0, :B].reshape(B, 1)


def init_params(key):
    """Deterministic init matching nn.Linear (uniform +-1/sqrt(fan_in)), PyTorch layout."""
    ks = jax.random.split(key, 6)

    def lin(kw, kb, fan_in, fan_out):
        bound = 1.0 / jnp.sqrt(jnp.float32(fan_in))
        w = jax.random.uniform(kw, (fan_out, fan_in), jnp.float32, -bound, bound)
        b = jax.random.uniform(kb, (fan_out,), jnp.float32, -bound, bound)
        return w, b

    w1, b1 = lin(ks[0], ks[1], D_IN, H1)
    w2, b2 = lin(ks[2], ks[3], H1, H2)
    w3, b3 = lin(ks[4], ks[5], H2, D_OUT)
    return {"w1": w1, "b1": b1, "w2": w2, "b2": b2, "w3": w3, "b3": b3}


def reference_forward(x, p):
    h1 = _leaky_relu(x @ p["w1"].T + p["b1"])
    h2 = _leaky_relu(h1 @ p["w2"].T + p["b2"])
    return jax.nn.sigmoid(h2 @ p["w3"].T + p["b3"])


if __name__ == "__main__":
    key = jax.random.PRNGKey(0)
    k_x, k_x2, k_x3, k_p = jax.random.split(key, 4)
    params = init_params(k_p)

    # Small batch: single 128-lane tile, exercises the 8 -> 128 padding path.
    x = jax.random.normal(k_x, (8, D_IN), jnp.float32)
    out = jax.block_until_ready(discriminator_forward(x, params))
    ref = reference_forward(x, params)
    assert out.shape == (8, 1), out.shape
    assert jnp.allclose(out, ref, atol=1e-5, rtol=0.0), float(jnp.max(jnp.abs(out - ref)))

    # Ragged batch: 2 grid tiles (v7x split), single sub-chunk each.
    x2 = jax.random.normal(k_x2, (260, D_IN), jnp.float32)
    out2 = jax.block_until_ready(discriminator_forward(x2, params))
    ref2 = reference_forward(x2, params)
    assert out2.shape == (260, 1), out2.shape
    assert jnp.allclose(out2, ref2, atol=1e-5, rtol=0.0), float(jnp.max(jnp.abs(out2 - ref2)))

    # Larger ragged batch: exercises the in-kernel multi-chunk fori_loop path.
    x3 = jax.random.normal(k_x3, (1500, D_IN), jnp.float32)
    out3 = jax.block_until_ready(discriminator_forward(x3, params))
    ref3 = reference_forward(x3, params)
    assert out3.shape == (1500, 1), out3.shape
    assert jnp.allclose(out3, ref3, atol=1e-5, rtol=0.0), float(jnp.max(jnp.abs(out3 - ref3)))

    print("KERNEL_OK")
</pallas_src>

<mosaic_0001>
module attributes {stable_mosaic.version = 11 : i64} {
  func.func @_discriminator_kernel(%arg0: i32, %arg1: memref<2x128xf32, #tpu.memory_space<vmem>>, %arg2: memref<20x35xf32, #tpu.memory_space<vmem>>, %arg3: memref<1x128xf32, #tpu.memory_space<vmem>>) attributes {dimension_semantics = [#tpu.dimension_semantics<parallel>], iteration_bounds = array<i64: 1>, scalar_prefetch = 0 : i64, scratch_operands = 0 : i64, tpu.core_type = #tpu.core_type<tc>, window_params = [{transform_indices = @transform_0, window_bounds = array<i64: 2, 128>}, {pipeline_mode = #tpu.pipeline_mode<synchronous>, transform_indices = @transform_1, window_bounds = array<i64: 20, 35>}, {transform_indices = @transform_2, window_bounds = array<i64: 1, 128>}]} {
    %c0 = arith.constant 0 : index
    %c0_0 = arith.constant 0 : index
    %0 = vector.load %arg2[%c0, %c0_0] : memref<20x35xf32, #tpu.memory_space<vmem>>, vector<20x35xf32>
    %1 = vector.extract_strided_slice %0 {offsets = [0, 0], sizes = [20, 2], strides = [1, 1]} : vector<20x35xf32> to vector<20x2xf32>
    %2 = vector.extract_strided_slice %0 {offsets = [0, 3], sizes = [10, 20], strides = [1, 1]} : vector<20x35xf32> to vector<10x20xf32>
    %3 = vector.extract_strided_slice %0 {offsets = [0, 24], sizes = [1, 10], strides = [1, 1]} : vector<20x35xf32> to vector<1x10xf32>
    %4 = vector.extract_strided_slice %0 {offsets = [0, 2], sizes = [20, 1], strides = [1, 1]} : vector<20x35xf32> to vector<20x1xf32>
    %5 = vector.shape_cast %4 : vector<20x1xf32> to vector<20x1xf32>
    %6 = vector.broadcast %5 : vector<20x1xf32> to vector<20x128xf32>
    %7 = vector.extract_strided_slice %0 {offsets = [0, 23], sizes = [10, 1], strides = [1, 1]} : vector<20x35xf32> to vector<10x1xf32>
    %8 = vector.shape_cast %7 : vector<10x1xf32> to vector<10x1xf32>
    %9 = vector.broadcast %8 : vector<10x1xf32> to vector<10x128xf32>
    %10 = vector.extract_strided_slice %0 {offsets = [0, 34], sizes = [1, 1], strides = [1, 1]} : vector<20x35xf32> to vector<1x1xf32>
    %11 = vector.shape_cast %10 : vector<1x1xf32> to vector<1x1xf32>
    %12 = vector.broadcast %11 : vector<1x1xf32> to vector<1x128xf32>
    %c0_i32 = arith.constant 0 : i32
    %c128_i32 = arith.constant 128 : i32
    %13 = arith.muli %c0_i32, %c128_i32 : i32
    %14 = tpu.assume_multiple %13, 128 : i32
    %c0_1 = arith.constant 0 : index
    %15 = arith.index_cast %14 : i32 to index
    %16 = vector.load %arg1[%c0_1, %15] : memref<2x128xf32, #tpu.memory_space<vmem>>, vector<2x128xf32>
    %cst = arith.constant dense<0.000000e+00> : vector<20x128xf32>
    %17 = tpu.matmul %1, %16, %cst {dimension_numbers = #tpu.dot_dimension_numbers<[1], [0], [0], [1], [0, 0, 1, 1], [], []>} : vector<20x2xf32>, vector<2x128xf32>, vector<20x128xf32> -> vector<20x128xf32>
    %18 = arith.addf %6, %17 : vector<20x128xf32>
    %cst_2 = arith.constant 0.000000e+00 : f32
    %19 = vector.broadcast %cst_2 : f32 to vector<20x128xf32>
    %20 = arith.cmpf ogt, %18, %19 : vector<20x128xf32>
    %cst_3 = arith.constant 0.00999999977 : f32
    %21 = vector.broadcast %cst_3 : f32 to vector<20x128xf32>
    %22 = arith.mulf %21, %18 : vector<20x128xf32>
    %23 = arith.select %20, %18, %22 : vector<20x128xi1>, vector<20x128xf32>
    %cst_4 = arith.constant dense<0.000000e+00> : vector<10x128xf32>
    %24 = tpu.matmul %2, %23, %cst_4 {dimension_numbers = #tpu.dot_dimension_numbers<[1], [0], [0], [1], [0, 0, 1, 1], [], []>} : vector<10x20xf32>, vector<20x128xf32>, vector<10x128xf32> -> vector<10x128xf32>
    %25 = arith.addf %9, %24 : vector<10x128xf32>
    %cst_5 = arith.constant 0.000000e+00 : f32
    %26 = vector.broadcast %cst_5 : f32 to vector<10x128xf32>
    %27 = arith.cmpf ogt, %25, %26 : vector<10x128xf32>
    %cst_6 = arith.constant 0.00999999977 : f32
    %28 = vector.broadcast %cst_6 : f32 to vector<10x128xf32>
    %29 = arith.mulf %28, %25 : vector<10x128xf32>
    %30 = arith.select %27, %25, %29 : vector<10x128xi1>, vector<10x128xf32>
    %cst_7 = arith.constant dense<0.000000e+00> : vector<1x128xf32>
    %31 = tpu.matmul %3, %30, %cst_7 {dimension_numbers = #tpu.dot_dimension_numbers<[1], [0], [0], [1], [0, 0, 1, 1], [], []>} : vector<1x10xf32>, vector<10x128xf32>, vector<1x128xf32> -> vector<1x128xf32>
    %32 = arith.addf %12, %31 : vector<1x128xf32>
    %cst_8 = arith.constant 0.000000e+00 : f32
    %33 = vector.broadcast %cst_8 : f32 to vector<1x128xf32>
    %34 = arith.subf %33, %32 : vector<1x128xf32>
    %35 = math.exp %34 : vector<1x128xf32>
    %cst_9 = arith.constant 1.000000e+00 : f32
    %36 = vector.broadcast %cst_9 : f32 to vector<1x128xf32>
    %37 = arith.addf %36, %35 : vector<1x128xf32>
    %cst_10 = arith.constant 1.000000e+00 : f32
    %38 = vector.broadcast %cst_10 : f32 to vector<1x128xf32>
    %39 = arith.divf %38, %37 : vector<1x128xf32>
    %c0_11 = arith.constant 0 : index
    %40 = arith.index_cast %14 : i32 to index
    %41 = vector.load %arg3[%c0_11, %40] : memref<1x128xf32, #tpu.memory_space<vmem>>, vector<1x128xf32>
    tpu.vector_store %arg3[%c0_11, %40], %39 {strides = array<i32>} : memref<1x128xf32, #tpu.memory_space<vmem>>, vector<1x128xf32>,
    %c1_i32 = arith.constant 1 : i32
    return
  }
  func.func @transform_0(%arg0: i32) -> (i32, i32) {
    %c0_i32 = arith.constant 0 : i32
    %c0_i32_0 = arith.constant 0 : i32
    return %c0_i32, %arg0 : i32, i32
  }
  func.func @transform_1(%arg0: i32) -> (i32, i32) {
    %c0_i32 = arith.constant 0 : i32
    %c0_i32_0 = arith.constant 0 : i32
    %c0_i32_1 = arith.constant 0 : i32
    return %c0_i32, %c0_i32_0 : i32, i32
  }
  func.func @transform_2(%arg0: i32) -> (i32, i32) {
    %c0_i32 = arith.constant 0 : i32
    %c0_i32_0 = arith.constant 0 : i32
    return %c0_i32, %arg0 : i32, i32
  }
}

</mosaic_0001>

<bundles_post_ra>
// kernel: discriminator_forward.1
= control target key start
LH: loop header
LB: loop body
LE: loop exit
PB: predicated region body
PF: predicated region fallthrough
CT: control target
= control target key end

     0   :  { %vm49_vm0 = vcmask 1041408   ;;  %v406_v0 = vmov 0.0   ;;  %vm407_vm1 = vmmov 0   ;;  %vm42_vm2 = vcmask 15360   ;;  %s409_s16 = smov 125   ;;  %s469_s0 = inlined_call_operand.vmem [shape: f32[2,128], index: 0, kind: input, shape index: {}]   ;;  %s470_s1 = inlined_call_operand.vmem [shape: f32[20,35], index: 1, kind: input, shape index: {}]   ;;  %s471_s2 = inlined_call_operand.vmem [shape: f32[1,128], index: 2, kind: output, shape index: {}]  }
   0x1   :  { %352 = vmatprep.subr.mxu0 %v406_v0  ;;  %v41_v1 = vld [vmem:[%s469_s0] sm:$0x3]  ;;  %354 = vmatprep.mubr.msk.f32.mxu0 %vm407_vm1, %v406_v0  ;;  %v408_v3 = vmov 2   ;;  %v12_v4 = vld [vmem:[%s470_s1 + $0x8] sm:$0xff]  ;;  %v13_v5 = vld [vmem:[%s470_s1 + $0x10] sm:$0xf] }
   0x2   :  { %v439_v2 = vld [vmem:[%s470_s1] sm:$0xff]  ;;  %353 = vmatpush3.msk.msra.mxu0 %vm49_vm0, %v41_v1  ;;  %396 = vset.pattern.permute.xlu0 %v408_v3  ;;  %v410_v6 = vmov 23   ;;  %s411_s1 = smov 104   ;;  %vm149_vm3 = vcmask 162816   ;;  %vm154_vm7 = vcmask 1043456   ;;  %v412_v28 = vmov 0.0|0.0  }
   0x3   :  { %355 = vmatmul.mubr.msk.f32.vlgmr.msra.gmra.mrb[0].mxu0 %vm42_vm2, %v439_v2  ;;  %16 = vperm.xlu0 %396, %v439_v2   ;;  %v413_v29 = vmov 34   ;;  %vm414_vm10 = vmmov 1   ;;  %vm243_vm12 = vcmask 80896  }
   0x4   :  { %357 = vmatprep.mubr.msk.f32.mxu0 %vm407_vm1, %v406_v0  ;;  %397 = vset.pattern.permute.xlu1 %v408_v3  ;;  %vm385_vm11 = vmpackc.low %vm49_vm0, %vm414_vm10 }
   0x5   :  { %26 = vperm.xlu1 %397, %v13_v5  }
   0x7   :  { %358 = vmatmul.mubr.msk.f32.gmra.mrb[2].mxu0 %vm42_vm2, %v12_v4  ;;  %21 = vperm.xlu0 %396, %v12_v4  }
   0x8   :  { %360 = vmatprep.mubr.msk.f32.mxu0 %vm407_vm1, %v406_v0 }
   0x9   :  { %145 = vrot.lane.b32.xlu1 %v439_v2, %s409_s16 }
   0xa   :  { %398 = vset.pattern.permute.xlu1 %v410_v6 }
   0xb   :  { %361 = vmatmul.mubr.msk.f32.gmra.mrb[4].mxu0 %vm42_vm2, %v13_v5  ;;  %147 = vrot.lane.b32.xlu0 %v12_v4, %s409_s16 }
   0xc   :  { %399 = vset.pattern.permute.xlu0 %v410_v6 }
   0xd   :  { %30 = vperm.xlu1 %398, %v439_v2  }
   0xf   :  { %34 = vperm.xlu0 %399, %v12_v4  }
  0x11   :  { %241 = vrot.lane.b32.xlu1 %v439_v2, %s411_s1 }
  0x12   :  { %400 = vset.pattern.permute.xlu1 %v413_v29 }
  0x13   :  { %401 = vset.pattern.permute.xlu0 %v413_v29 }
  0x15   :  { %38 = vperm.xlu1 %400, %v439_v2  }
  0x82   :  { %v17_v9 = vpop.permute.xlu0 %16 }
  0x84   :  { %v27_v7 = vpop.permute.xlu1 %26 }
  0x86   :  { %v22_v13 = vpop.permute.xlu0 %21 }
  0x88   :  { %v146_v8 = vpop.permute.xlu1 %145 }
  0x89   :  { %369 = vmatprep.mubr.msk.f32.mxu1 %vm149_vm3, %v146_v8 }
  0x8a   :  { %v148_v27 = vpop.permute.xlu0 %147 }
  0x8c   :  { %v31_v31 = vpop.permute.xlu1 %30 }
  0x8e   :  { %v35_v30 = vpop.permute.xlu0 %34 }
  0x90   :  { %v242_v41 = vpop.permute.xlu1 %241 }
  0x94   :  { %v39_v42 = vpop.permute.xlu1 %38 }
  0xd6   :  { %v119_v10 = vpop.f32.mrb[0].mxu0 }
  0xd7   :  { %v133_v11 = vadd.f32 %v119_v10, %v17_v9  ;;  %v356_v12 = vpop.f32.mrb[1].mxu0 }
  0xd9   :  { %v139_v15 = vmul.f32 0.01, %v133_v11  ;;  %vm136_vm4 = vcmp.gt.f32.partialorder %v133_v11, 0.0 }
  0xda   :  { %v124_v14 = vpop.f32.mrb[2].mxu0 }
  0xdb   :  { %v134_v16 = vadd.f32 %v124_v14, %v22_v13  ;;  %v359_v17 = vpop.f32.mrb[3].mxu0  ;;  %v142_v22 = vsel %vm136_vm4, %v133_v11, %v139_v15 }
  0xdd   :  { %v140_v18 = vmul.f32 0.01, %v134_v16  ;;  %vm137_vm5 = vcmp.gt.f32.partialorder %v134_v16, 0.0 }
  0xde   :  { %v129_v19 = vpop.f32.mrb[4].mxu0 }
  0xdf   :  { %v135_v20 = vadd.f32 %v129_v19, %v27_v7  ;;  %v362_v21 = vpop.f32.mrb[5].mxu0  ;;  %v143_v23 = vsel %vm137_vm5, %v134_v16, %v140_v18 }
  0xe0   :  { %v379_v24 = vpack.c.bf16 %v143_v23, %v142_v22 }
  0xe1   :  { %vm138_vm6 = vcmp.gt.f32.partialorder %v135_v20, 0.0  ;;  %v141_v25 = vmul.f32 0.01, %v135_v20 }
  0xe2   :  { %380 = vmatprep.subr.bf16.mxu1 %v379_v24 }
  0xe3   :  { %382 = vmatpush3.bf16.msra.mxu1 %v379_v24  ;;  %v144_v26 = vsel %vm138_vm6, %v135_v20, %v141_v25 }
  0xe4   :  { %367 = vmatprep.subr.msk.mxu1 %vm154_vm7, %v144_v26 }
  0xe7   :  { %368 = vmatpush3.msk.msra.mxu1 %vm154_vm7, %v144_v26 }
  0xe8   :  { %370 = vmatmul.mubr.msk.f32.vlgmr.msra.gmra.mrb[0].mxu1 %vm149_vm3, %v148_v27  ;;  %383 = vmatprep.subr.bf16.mxu1 %v412_v28 }
  0xe9   :  { %376 = vmatprep.mubr.msk.f32.mxu1 %vm407_vm1, %v406_v0 }
 0x1bb   :  { %v371_v32 = vpop.f32.mrb[0].mxu1 }
 0x1bc   :  { %v234_v33 = vadd.f32 %v371_v32, %v35_v30  ;;  %v224_v34 = vpop.f32.mrb[1].mxu1 }
 0x1bd   :  { %v233_v35 = vadd.f32 %v224_v34, %v31_v31 }
 0x1be   :  { %vm236_vm8 = vcmp.gt.f32.partialorder %v234_v33, 0.0  ;;  %v238_v36 = vmul.f32 0.01, %v234_v33 }
 0x1bf   :  { %vm235_vm9 = vcmp.gt.f32.partialorder %v233_v35, 0.0  ;;  %v237_v37 = vmul.f32 0.01, %v233_v35 }
 0x1c0   :  { %v240_v38 = vsel %vm236_vm8, %v234_v33, %v238_v36 }
 0x1c1   :  { %v239_v39 = vsel %vm235_vm9, %v233_v35, %v237_v37 }
 0x1c2   :  { %v384_v40 = vpack.c.bf16 %v240_v38, %v239_v39 }
 0x1c4   :  { %386 = vmatpush3.bf16.msk.msra.mxu1 %vm385_vm11, %v384_v40 }
 0x1c7   :  { %377 = vmatmul.mubr.msk.f32.vlgmr.msra.gmra.mrb[2].mxu1 %vm243_vm12, %v242_v41 }
 0x29a   :  { %v315_v43 = vpop.f32.mrb[2].mxu1 }
 0x29b   :  { %v319_v44 = vadd.f32 %v315_v43, %v39_v42  ;;  %v378_v45 = vpop.f32.mrb[3].mxu1 }
 0x29d   :  { %v320_v46 = vsub.f32 0.0, %v319_v44 }
 0x29f   :  { %v321_v47 = vmul.f32 1.442695, %v320_v46 }
 0x2a1   :  { %402 = vpow2.f32 %v321_v47 }
 0x2ab   :  { %v403_v48 = vpop.eup %402 }
 0x2ac   :  { %v323_v49 = vadd.f32 1.0, %v403_v48 }
 0x2ae   :  { %404 = vrcp.f32 %v323_v49 }
 0x2b8   :  { %v405_v50 = vpop.eup %404 }
 0x2b9   :  { %326 = vst [vmem:[%s471_s2] sm:$0x1] %v405_v50 }

</bundles_post_ra>
